<compile_context>
chip_gen: v7x
topology: tpu7x:2x2x1
jax: 0.10.0
libtpu: 0.0.40
codegen_flags: <defaults>
</compile_context>

<pallas_src>
import jax
import jax.numpy as jnp
import numpy as np
from jax.experimental import pallas as pl
from jax.experimental.pallas import tpu as pltpu

# ----------------------------- config --------------------------------------
DIM = 32          # dim
REDUCTION = 1     # reduction
B = 2             # batch
H = 16            # height
W = 16            # width


# ----------------------------- kernel ---------------------------------------
def _make_kernel(c, cr):
    """Kernel closure over the static channel sizes."""

    def spatial_weights_kernel(x1_ref, x2_ref, p_ref, o_ref):
        # x1_ref / x2_ref: (C, HW)  -- one batch element, pixels on lanes.
        # p_ref: (Cr+2, 2C+1) packed params:
        #   rows 0:Cr    -> [ w1 (Cr, 2C) | b1 (Cr, 1) ]
        #   rows Cr:Cr+2 -> [ w2 (2, Cr)  | b2 (2, 1)  | zero pad ]
        # o_ref: (2, HW)

        # Fold the channel concat into one MXU pass: sublane concat in VMEM,
        # then a single K = 2C dot (bf16 operands, f32 accumulation).
        xcat = jnp.concatenate([x1_ref[...], x2_ref[...]], axis=0)   # (2C, HW)
        xcat = xcat.astype(jnp.bfloat16)

        w1 = p_ref[:cr, :2 * c].astype(jnp.bfloat16)                 # (Cr, 2C)
        b1 = p_ref[:cr, 2 * c:2 * c + 1]                             # (Cr, 1) f32
        w2 = p_ref[cr:cr + 2, :cr].astype(jnp.bfloat16)              # (2, Cr)
        b2 = p_ref[cr:cr + 2, cr:cr + 1]                             # (2, 1) f32

        # 1x1 conv #1 + bias + ReLU (f32 epilogue).
        h = jnp.dot(w1, xcat, preferred_element_type=jnp.float32) + b1
        h = jnp.maximum(h, 0.0)                                      # (Cr, HW)

        # 1x1 conv #2 + bias + sigmoid.
        logits = jnp.dot(w2, h.astype(jnp.bfloat16),
                         preferred_element_type=jnp.float32) + b2    # (2, HW)
        # Exact sigmoid (512 elems -> divide cost is negligible; the
        # approx-reciprocal EUP variant is a micro-win that risks tolerance).
        o_ref[...] = (1.0 / (1.0 + jnp.exp(-logits))).astype(o_ref.dtype)

    return spatial_weights_kernel


# ----------------------------- wrapper ---------------------------------------
def spatial_weights(x1, x2, params):
    """Pallas implementation of SpatialWeights.forward -> (2, B, 1, H, W)."""
    b, c, h, w = x1.shape
    hw = h * w
    t = b * hw
    cr = params["w1"].shape[0]

    # Free reshapes only (contiguous merge of the trailing spatial dims).
    x1r = x1.reshape(b, c, hw)
    x2r = x2.reshape(b, c, hw)

    # Pack every parameter into ONE small array -> one resident DMA.
    p = jnp.zeros((cr + 2, 2 * c + 1), jnp.float32)
    p = p.at[:cr, :2 * c].set(params["w1"])
    p = p.at[:cr, 2 * c].set(params["b1"])
    p = p.at[cr:cr + 2, :cr].set(params["w2"])
    p = p.at[cr:cr + 2, cr].set(params["b2"])

    # Advisory cost estimate for XLA scheduling around the custom call.
    flops = b * (2 * cr * (2 * c) * hw + 2 * 2 * cr * hw + 8 * 2 * hw)
    bytes_accessed = 4 * (x1r.size + x2r.size + p.size + 2 * t)
    cost = pl.CostEstimate(flops=flops, transcendentals=2 * t,
                           bytes_accessed=bytes_accessed)

    vmem = pltpu.MemorySpace.VMEM
    out = pl.pallas_call(
        _make_kernel(c, cr),
        out_shape=jax.ShapeDtypeStruct((2, t), x1.dtype),
        grid=(b,),
        in_specs=[
            pl.BlockSpec((pl.Squeezed(), c, hw), lambda i: (i, 0, 0),
                         memory_space=vmem),
            pl.BlockSpec((pl.Squeezed(), c, hw), lambda i: (i, 0, 0),
                         memory_space=vmem),
            # Same block every step -> fetched once, stays resident in VMEM.
            pl.BlockSpec((cr + 2, 2 * c + 1), lambda i: (0, 0),
                         memory_space=vmem),
        ],
        out_specs=pl.BlockSpec((2, hw), lambda i: (0, i), memory_space=vmem),
        compiler_params=pltpu.CompilerParams(
            dimension_semantics=("arbitrary",)),
        cost_estimate=cost,
    )(x1r, x2r, p)

    # (2, B*HW) -> (2, B, 1, H, W): identical element order to the PyTorch
    # reshape(B,2,1,H,W).permute(1,0,2,3,4); pure metadata, no copy.
    return out.reshape(2, b, 1, h, w)


# ----------------------------- reference -------------------------------------
def spatial_weights_ref(x1, x2, p):
    """Pure-JAX (f32, highest precision) mirror of the PyTorch forward."""
    b, c, h, w = x1.shape
    xcat = jnp.concatenate([x1, x2], axis=1)                       # (B, 2C, H, W)
    hid = jax.nn.relu(
        jnp.einsum("oc,bchw->bohw", p["w1"], xcat, precision="highest")
        + p["b1"][None, :, None, None])
    out = jax.nn.sigmoid(
        jnp.einsum("oc,bchw->bohw", p["w2"], hid, precision="highest")
        + p["b2"][None, :, None, None])                            # (B, 2, H, W)
    return out.reshape(b, 2, 1, h, w).transpose(1, 0, 2, 3, 4)     # (2, B, 1, H, W)


# ----------------------------- params -----------------------------------------
def make_params(key, dim=DIM, reduction=REDUCTION):
    cr = dim // reduction
    ks = jax.random.split(key, 4)
    s = 0.05
    rnd = lambda k, shape: jax.random.normal(k, shape, jnp.float32) * s
    return {
        # Conv2d(2*dim, dim//reduction, 1): weight (Cr, 2*dim), bias (Cr,)
        "w1": rnd(ks[0], (cr, 2 * dim)),
        "b1": rnd(ks[1], (cr,)),
        # Conv2d(dim//reduction, 2, 1): weight (2, Cr), bias (2,)
        "w2": rnd(ks[2], (2, cr)),
        "b2": rnd(ks[3], (2,)),
    }


# ----------------------------- main -------------------------------------------
if __name__ == "__main__":
    key = jax.random.PRNGKey(0)
    kx1, kx2, kp = jax.random.split(key, 3)
    x1 = jax.random.normal(kx1, (B, DIM, H, W), jnp.float32)
    x2 = jax.random.normal(kx2, (B, DIM, H, W), jnp.float32)
    params = make_params(kp)

    fwd = jax.jit(spatial_weights)
    out = jax.block_until_ready(fwd(x1, x2, params))
    ref = spatial_weights_ref(x1, x2, params)

    assert out.shape == (2, B, 1, H, W), out.shape
    # bf16 MXU operands (f32 accumulation) -> slightly looser tolerance than
    # the pure-f32 reference.
    np.testing.assert_allclose(np.asarray(out), np.asarray(ref),
                               rtol=2e-2, atol=2e-3)
    print("KERNEL_OK")
</pallas_src>

<mosaic_0001>
module attributes {stable_mosaic.version = 11 : i64} {
  func.func @spatial_weights_kernel(%arg0: i32, %arg1: memref<1x32x256xf32, #tpu.memory_space<vmem>>, %arg2: memref<1x32x256xf32, #tpu.memory_space<vmem>>, %arg3: memref<34x65xf32, #tpu.memory_space<vmem>>, %arg4: memref<2x256xf32, #tpu.memory_space<vmem>>) attributes {dimension_semantics = [#tpu.dimension_semantics<arbitrary>], iteration_bounds = array<i64: 2>, scalar_prefetch = 0 : i64, scratch_operands = 0 : i64, tpu.core_type = #tpu.core_type<tc>, window_params = [{transform_indices = @transform_0, window_bounds = array<i64: 1, 32, 256>}, {transform_indices = @transform_1, window_bounds = array<i64: 1, 32, 256>}, {pipeline_mode = #tpu.pipeline_mode<synchronous>, transform_indices = @transform_2, window_bounds = array<i64: 34, 65>}, {transform_indices = @transform_3, window_bounds = array<i64: 2, 256>}]} {
    %c0 = arith.constant 0 : index
    %c0_0 = arith.constant 0 : index
    %c0_1 = arith.constant 0 : index
    %0 = vector.load %arg1[%c0, %c0_0, %c0_1] : memref<1x32x256xf32, #tpu.memory_space<vmem>>, vector<1x32x256xf32>
    %1 = vector.shape_cast %0 : vector<1x32x256xf32> to vector<32x256xf32>
    %c0_2 = arith.constant 0 : index
    %c0_3 = arith.constant 0 : index
    %c0_4 = arith.constant 0 : index
    %2 = vector.load %arg2[%c0_2, %c0_3, %c0_4] : memref<1x32x256xf32, #tpu.memory_space<vmem>>, vector<1x32x256xf32>
    %3 = vector.shape_cast %2 : vector<1x32x256xf32> to vector<32x256xf32>
    %4 = tpu.concatenate %1, %3 in 0 : vector<32x256xf32>, vector<32x256xf32> -> vector<64x256xf32>
    %5 = arith.truncf %4 : vector<64x256xf32> to vector<64x256xbf16>
    %c0_5 = arith.constant 0 : index
    %c0_6 = arith.constant 0 : index
    %6 = vector.load %arg3[%c0_5, %c0_6] : memref<34x65xf32, #tpu.memory_space<vmem>>, vector<32x64xf32>
    %7 = arith.truncf %6 : vector<32x64xf32> to vector<32x64xbf16>
    %c0_7 = arith.constant 0 : index
    %c64 = arith.constant 64 : index
    %8 = vector.load %arg3[%c0_7, %c64] : memref<34x65xf32, #tpu.memory_space<vmem>>, vector<32x1xf32>
    %c32 = arith.constant 32 : index
    %c0_8 = arith.constant 0 : index
    %9 = vector.load %arg3[%c32, %c0_8] : memref<34x65xf32, #tpu.memory_space<vmem>>, vector<2x32xf32>
    %10 = arith.truncf %9 : vector<2x32xf32> to vector<2x32xbf16>
    %c32_9 = arith.constant 32 : index
    %c32_10 = arith.constant 32 : index
    %11 = vector.load %arg3[%c32_9, %c32_10] : memref<34x65xf32, #tpu.memory_space<vmem>>, vector<2x1xf32>
    %cst = arith.constant dense<0.000000e+00> : vector<32x256xf32>
    %12 = tpu.matmul %7, %5, %cst {dimension_numbers = #tpu.dot_dimension_numbers<[1], [0], [0], [1], [0, 0, 1, 1], [], []>} : vector<32x64xbf16>, vector<64x256xbf16>, vector<32x256xf32> -> vector<32x256xf32>
    %13 = vector.broadcast %8 : vector<32x1xf32> to vector<32x256xf32>
    %14 = arith.addf %12, %13 : vector<32x256xf32>
    %cst_11 = arith.constant 0.000000e+00 : f32
    %15 = vector.broadcast %cst_11 : f32 to vector<32x256xf32>
    %16 = arith.maximumf %14, %15 : vector<32x256xf32>
    %17 = arith.truncf %16 : vector<32x256xf32> to vector<32x256xbf16>
    %cst_12 = arith.constant dense<0.000000e+00> : vector<2x256xf32>
    %18 = tpu.matmul %10, %17, %cst_12 {dimension_numbers = #tpu.dot_dimension_numbers<[1], [0], [0], [1], [0, 0, 1, 1], [], []>} : vector<2x32xbf16>, vector<32x256xbf16>, vector<2x256xf32> -> vector<2x256xf32>
    %19 = vector.broadcast %11 : vector<2x1xf32> to vector<2x256xf32>
    %20 = arith.addf %18, %19 : vector<2x256xf32>
    %cst_13 = arith.constant 0.000000e+00 : f32
    %21 = vector.broadcast %cst_13 : f32 to vector<2x256xf32>
    %22 = arith.subf %21, %20 : vector<2x256xf32>
    %23 = math.exp %22 : vector<2x256xf32>
    %cst_14 = arith.constant 1.000000e+00 : f32
    %24 = vector.broadcast %cst_14 : f32 to vector<2x256xf32>
    %25 = arith.addf %24, %23 : vector<2x256xf32>
    %cst_15 = arith.constant 1.000000e+00 : f32
    %26 = vector.broadcast %cst_15 : f32 to vector<2x256xf32>
    %27 = arith.divf %26, %25 : vector<2x256xf32>
    %c0_16 = arith.constant 0 : index
    %c0_17 = arith.constant 0 : index
    %28 = vector.load %arg4[%c0_16, %c0_17] : memref<2x256xf32, #tpu.memory_space<vmem>>, vector<2x256xf32>
    tpu.vector_store %arg4[%c0_16, %c0_17], %27 {strides = array<i32>} : memref<2x256xf32, #tpu.memory_space<vmem>>, vector<2x256xf32>,
    return
  }
  func.func @transform_0(%arg0: i32) -> (i32, i32, i32) {
    %c0_i32 = arith.constant 0 : i32
    %c0_i32_0 = arith.constant 0 : i32
    %c0_i32_1 = arith.constant 0 : i32
    return %arg0, %c0_i32, %c0_i32_0 : i32, i32, i32
  }
  func.func @transform_1(%arg0: i32) -> (i32, i32, i32) {
    %c0_i32 = arith.constant 0 : i32
    %c0_i32_0 = arith.constant 0 : i32
    %c0_i32_1 = arith.constant 0 : i32
    return %arg0, %c0_i32, %c0_i32_0 : i32, i32, i32
  }
  func.func @transform_2(%arg0: i32) -> (i32, i32) {
    %c0_i32 = arith.constant 0 : i32
    %c0_i32_0 = arith.constant 0 : i32
    %c0_i32_1 = arith.constant 0 : i32
    return %c0_i32, %c0_i32_0 : i32, i32
  }
  func.func @transform_3(%arg0: i32) -> (i32, i32) {
    %c0_i32 = arith.constant 0 : i32
    %c0_i32_0 = arith.constant 0 : i32
    return %c0_i32, %arg0 : i32, i32
  }
}

</mosaic_0001>

<bundles_post_ra>
// kernel: spatial_weights.1
= control target key start
LH: loop header
LB: loop body
LE: loop exit
PB: predicated region body
PF: predicated region fallthrough
CT: control target
= control target key end

     0   :  { %s531_s12 = smov 0   ;;  %s581_s0 = inlined_call_operand.vmem [shape: f32[2,32,256], index: 0, kind: input, shape index: {}]   ;;  %s582_s1 = inlined_call_operand.vmem [shape: f32[2,32,256], index: 1, kind: input, shape index: {}]   ;;  %s583_s2 = inlined_call_operand.vmem [shape: f32[34,65], index: 2, kind: input, shape index: {}]   ;;  %s584_s3 = inlined_call_operand.vmem [shape: f32[2,512], index: 3, kind: output, shape index: {}]  }
   0x1 LB: > { %s537_s13 = sadd.s32 4294967295, %s506_s12   ;;  %p463_p0 = scmp.ge.s32.totalorder %s506_s12, 1  ;;  %s506_s12 = sphi %s531_s12, %s13_s12  }
   0x2   : > { %p147_p1 = scmp.lt.s32.totalorder %s506_s12, 3 }
   0x4   : > { %p148_p2 = pnand %p463_p0, %p147_p1 }
   0x5   : > { %p176_p3 = scmp.lt.s32.totalorder (!%p148_p2), %s537_s13, 1  ;;  %v508_v0 = vmov (!%p148_p2), 0   ;;  %v217_v1 = vld [vmem:[%s583_s2] sm:$0xff] (!%p148_p2)  ;;  %v219_v2 = vld [vmem:[%s583_s2 + $0x10] sm:$0xff] (!%p148_p2)  ;;  %v509_v3 = vmov (!%p148_p2), 64   ;;  %v218_v4 = vld [vmem:[%s583_s2 + $0x8] sm:$0xff] (!%p148_p2) }
   0x6   : > { %151 = sbr.rel (%p148_p2) target bundleno = 515 (0x203), region = 32  ;;  %284 = vmatprep.mubr.bf16.mxu0 (!%p148_p2), %v508_v0  ;;  %358 = vmatprep.mubr.bf16.mxu1 (!%p148_p2), %v508_v0  ;;  %v220_v5 = vld [vmem:[%s583_s2 + $0x18] sm:$0xff] (!%p148_p2)  ;;  %v221_v30 = vpack.c.bf16 (!%p148_p2), %v218_v4, %v217_v1  ;;  %vm245_vm0 = vcmask (!%p148_p2), 523264   ;;  %v223_v32 = vld [vmem:[%s583_s2 + $0x20] sm:$0x3] (!%p148_p2)  ;;  %v510_v33 = vmov (!%p148_p2), 32  }
   0x7   : > { %489 = vset.pattern.permute.xlu0 (!%p148_p2), %v509_v3  ;;  %490 = vset.pattern.permute.xlu1 (!%p148_p2), %v509_v3  ;;  %v222_v31 = vpack.c.bf16 (!%p148_p2), %v220_v5, %v219_v2  ;;  %vm322_vm1 = vcmask (!%p148_p2), 261120   ;;  %s468_s5 = sshll.u32 (!%p148_p2), %s537_s13, 1 }
   0x8   : > { %227 = vperm.xlu0 (!%p148_p2), %489, %v217_v1   ;;  %237 = vperm.xlu1 (!%p148_p2), %490, %v219_v2   ;;  %v224_v2 = vpack.c.bf16 (!%p148_p2), %v223_v32, %v223_v32  ;;  %p187_p4 = scmp.lt.s32.totalorder (!%p148_p2), %s468_s5, 3 }
   0xc   : > { %232 = vperm.xlu0 (!%p148_p2), %489, %v218_v4   ;;  %242 = vperm.xlu1 (!%p148_p2), %490, %v220_v5  }
   0xd   : > { %s177_s14 = scalar_select %p176_p3, %s537_s13, 1 }
   0xe   : > { %s586_s5 = smov (!%p187_p4, %s468_s5), 3 }
   0xf   : > { %s476_s19 = sshll.u32 %s177_s14, 6  ;;  %s469_s6 = sshll.u32 %s586_s5, 1 }
  0x10   : > { %s180_s22 = scalar_lea.vmem %s581_s0, %s476_s19  ;;  %s555_s25 = scalar_lea.vmem %s582_s1, %s476_s19  ;;  %491 = vset.pattern.permute.xlu0 %v510_v33 }
  0x11   : > { %v194_v6 = vld [vmem:[%s180_s22 + $0x8] sm:$0xff]  ;;  %v196_v7 = vld [vmem:[%s180_s22 + $0x18] sm:$0xff]  ;;  %v193_v8 = vld [vmem:[%s180_s22] sm:$0xff]  ;;  %319 = vperm.xlu0 %491, %v223_v32   ;;  %s190_s9 = scalar_lea.vmem %s584_s3, %s469_s6 }
  0x12   : > { %v210_v9 = vpack.c.bf16 %v196_v7, %v194_v6  ;;  %v195_v10 = vld [vmem:[%s180_s22 + $0x10] sm:$0xff]  ;;  %v198_v11 = vld [vmem:[%s180_s22 + $0x28] sm:$0xff]  ;;  %v200_v12 = vld [vmem:[%s180_s22 + $0x38] sm:$0xff] }
  0x13   : > { %v209_v13 = vpack.c.bf16 %v195_v10, %v193_v8  ;;  %v212_v14 = vpack.c.bf16 %v200_v12, %v198_v11  ;;  %v197_v15 = vld [vmem:[%s180_s22 + $0x20] sm:$0xff]  ;;  %v199_v16 = vld [vmem:[%s180_s22 + $0x30] sm:$0xff]  ;;  %v202_v17 = vld [vmem:[%s555_s25 + $0x8] sm:$0xff] }
  0x14   : > { %252 = vmatprep.subr.bf16.mxu0 %v210_v9  ;;  %v204_v18 = vld [vmem:[%s555_s25 + $0x18] sm:$0xff]  ;;  %v211_v19 = vpack.c.bf16 %v199_v16, %v197_v15  ;;  %v201_v21 = vld [vmem:[%s555_s25] sm:$0xff]  ;;  %v203_v22 = vld [vmem:[%s555_s25 + $0x10] sm:$0xff] }
  0x15   : > { %253 = vmatpush1.bf16.msra.mxu0 %v209_v13  ;;  %v214_v20 = vpack.c.bf16 %v204_v18, %v202_v17  ;;  %v206_v23 = vld [vmem:[%s555_s25 + $0x28] sm:$0xff]  ;;  %v208_v24 = vld [vmem:[%s555_s25 + $0x38] sm:$0xff]  ;;  %v213_v25 = vpack.c.bf16 %v203_v22, %v201_v21  ;;  %v205_v27 = vld [vmem:[%s555_s25 + $0x20] sm:$0xff] }
  0x16   : > { %254 = vmatprep.subr.bf16.mxu0 %v212_v14  ;;  %v216_v26 = vpack.c.bf16 %v208_v24, %v206_v23  ;;  %v207_v28 = vld [vmem:[%s555_s25 + $0x30] sm:$0xff] }
  0x17   : > { %v215_v29 = vpack.c.bf16 %v207_v28, %v205_v27 }
  0x19   : > { %255 = vmatpush1.bf16.msra.mxu0 %v211_v19 }
  0x1a   : > { %256 = vmatprep.subr.bf16.mxu0 %v214_v20 }
  0x1d   : > { %257 = vmatpush1.bf16.msra.mxu0 %v213_v25 }
  0x1e   : > { %258 = vmatprep.subr.bf16.mxu0 %v216_v26 }
  0x21   : > { %259 = vmatpush1.bf16.msra.mxu0 %v215_v29 }
  0x24   : > { %470 = vmatmul.mubr.msk.bf16.vlgmr.msra.gmra.mrb[0].mxu0 %vm245_vm0, %v221_v30 }
  0x25   : > { %294 = vmatprep.mubr.bf16.mxu0 %v508_v0 }
  0x2c   : > { %471 = vmatmul.mubr.msk.bf16.gmra.mrb[4].mxu0 %vm245_vm0, %v222_v31 }
  0x87   : > { %v228_v34 = vpop.permute.xlu0 %227  ;;  %v238_v43 = vpop.permute.xlu1 %237 }
  0x8b   : > { %v233_v36 = vpop.permute.xlu0 %232  ;;  %v243_v54 = vpop.permute.xlu1 %242 }
  0x90   : > { %v320_v3 = vpop.permute.xlu0 %319 }
  0xf7   : > { %v286_v35 = vpop.f32.mrb[0].mxu0 }
  0xf8   : > { %v287_v37 = vadd.f32 %v286_v35, %v228_v34  ;;  %v288_v38 = vpop.f32.mrb[1].mxu0 }
  0xf9   : > { %v289_v39 = vadd.f32 %v288_v38, %v228_v34  ;;  %v290_v40 = vpop.f32.mrb[2].mxu0 }
  0xfa   : > { %v291_v41 = vadd.f32 %v290_v40, %v233_v36  ;;  %v292_v42 = vpop.f32.mrb[3].mxu0  ;;  %v305_v45 = vmax.f32 %v287_v37, 0.0 }
  0xfb   : > { %v293_v44 = vadd.f32 %v292_v42, %v233_v36  ;;  %v306_v47 = vmax.f32 %v289_v39, 0.0 }
  0xfc   : > { %v307_v46 = vmax.f32 %v291_v41, 0.0 }
  0xfd   : > { %v308_v48 = vmax.f32 %v293_v44, 0.0 }
  0xfe   : > { %v313_v49 = vpack.c.bf16 %v307_v46, %v305_v45 }
  0xff   : > { %v296_v50 = vpop.f32.mrb[4].mxu0  ;;  %v314_v51 = vpack.c.bf16 %v308_v48, %v306_v47 }
 0x100   : > { %v297_v52 = vadd.f32 %v296_v50, %v238_v43  ;;  %v298_v53 = vpop.f32.mrb[5].mxu0 }
 0x101   : > { %v299_v55 = vadd.f32 %v298_v53, %v238_v43  ;;  %v300_v56 = vpop.f32.mrb[6].mxu0  ;;  %326 = vmatprep.subr.bf16.mxu1 %v314_v51 }
 0x102   : > { %v301_v57 = vadd.f32 %v300_v56, %v243_v54  ;;  %v302_v58 = vpop.f32.mrb[7].mxu0  ;;  %327 = vmatpush1.bf16.msra.mxu1 %v313_v49  ;;  %v309_v60 = vmax.f32 %v297_v52, 0.0 }
 0x103   : > { %v303_v59 = vadd.f32 %v302_v58, %v243_v54  ;;  %v310_v62 = vmax.f32 %v299_v55, 0.0 }
 0x104   : > { %v311_v61 = vmax.f32 %v301_v57, 0.0 }
 0x105   : > { %v312_v63 = vmax.f32 %v303_v59, 0.0 }
 0x106   : > { %v315_v0 = vpack.c.bf16 %v311_v61, %v309_v60 }
 0x107   : > { %v316_v1 = vpack.c.bf16 %v312_v63, %v310_v62 }
 0x109   : > { %328 = vmatprep.subr.bf16.mxu1 %v316_v1 }
 0x10a   : > { %329 = vmatpush1.bf16.msra.mxu1 %v315_v0 }
 0x10d   : > { %472 = vmatmul.mubr.msk.bf16.vlgmr.msra.gmra.mrb[0].mxu1 %vm322_vm1, %v224_v2 }
 0x1e0   : > { %v360_v4 = vpop.f32.mrb[0].mxu1 }
 0x1e1   : > { %v361_v5 = vadd.f32 %v360_v4, %v320_v3  ;;  %v362_v6 = vpop.f32.mrb[1].mxu1 }
 0x1e2   : > { %v363_v7 = vadd.f32 %v362_v6, %v320_v3  ;;  %v364_v8 = vpop.f32.mrb[2].mxu1 }
 0x1e3   : > { %v367_v9 = vsub.f32 0.0, %v361_v5  ;;  %v365_v10 = vpop.f32.mrb[3].mxu1 }
 0x1e4   : > { %v368_v11 = vsub.f32 0.0, %v363_v7 }
 0x1e5   : > { %v369_v12 = vmul.f32 1.442695, %v367_v9 }
 0x1e6   : > { %v371_v13 = vmul.f32 1.442695, %v368_v11 }
 0x1e7   : > { %492 = vpow2.f32 %v369_v12 }
 0x1e8   : > { %494 = vpow2.f32 %v371_v13 }
 0x1f1   : > { %v493_v14 = vpop.eup %492 }
 0x1f2   : > { %v495_v15 = vpop.eup %494  ;;  %v373_v16 = vadd.f32 1.0, %v493_v14 }
 0x1f3   : > { %v374_v17 = vadd.f32 1.0, %v495_v15 }
 0x1f4   : > { %496 = vrcp.f32 %v373_v16 }
 0x1f5   : > { %498 = vrcp.f32 %v374_v17 }
 0x1fe   : > { %v497_v18 = vpop.eup %496 }
 0x1ff   : > { %v499_v19 = vpop.eup %498 }
 0x200   : > { %v381_v20 = vcombine.low %v497_v18, %v499_v19 }
 0x202   : > { %473 = vst.sshfl [vmem:[%s190_s9] sm:$0x33 pattern:$0x76325410] %v381_v20 }
 0x203 PF: > { %s13_s12 = sadd.s32 1, %s506_s12  }
 0x204   : > { %p10_p5 = scmp.ge.s32.totalorder %s13_s12, 4  }
 0x206   :  { %12 = sbr.rel (!%p10_p5) target bundleno = 1 (0x1), region = 65 }

</bundles_post_ra>
